<compile_context>
chip_gen: v5e
topology: v5e:2x2
jax: 0.10.0
libtpu: 0.0.40
codegen_flags: <defaults>
</compile_context>

<pallas_src>
import jax
import jax.numpy as jnp
from jax.experimental import pallas as pl
from jax.experimental.pallas import tpu as pltpu


def _round_up(n, m):
    return ((n + m - 1) // m) * m


# ----------------------------------------------------------------------------
# Kernel
# ----------------------------------------------------------------------------
def resmlp_kernel(x_ref, w0_ref, b0_ref, w1_ref, b1_ref, w2_ref, b2_ref, o_ref):
    x = x_ref[...]

    # layers[0]: h = relu(x @ W0 + b0)            (f32 MXU accumulation)
    h = jnp.dot(x.astype(w0_ref.dtype), w0_ref[...],
                preferred_element_type=jnp.float32) + b0_ref[...]
    h = jnp.maximum(h, 0.0)

    # layers[1] (ReLU module inside the residual loop): h >= 0, so
    # h + relu(relu(h)) == 2*h exactly in fp32.
    h = h * 2.0

    # layers[2] (Linear module inside the residual loop): h = h + relu(W1 h + b1)
    y = jnp.dot(h.astype(w1_ref.dtype), w1_ref[...],
                preferred_element_type=jnp.float32) + b1_ref[...]
    h = h + jnp.maximum(y, 0.0)

    # layers[3] (ReLU module inside the residual loop): h >= 0 again -> 2*h.
    h = h * 2.0

    # layers[4]: final Linear, written as a narrow (tb, out_dim) block.
    out = jnp.dot(h.astype(w2_ref.dtype), w2_ref[...],
                  preferred_element_type=jnp.float32) + b2_ref[...]
    o_ref[...] = out.astype(o_ref.dtype)


# ----------------------------------------------------------------------------
# One-time parameter preparation (hoisted out of the per-call forward path)
# ----------------------------------------------------------------------------
def prepare_params(params, param_dtype=jnp.float32):
    """Cast weight matrices once (bf16 for the fast MXU path on v6e/v7x if
    desired); biases stay f32 so bias-add / relu stay on the f32 VPU path.
    No padding is required anymore (narrow output is written directly)."""
    p = {}
    for k in ("w0", "w1", "w2"):
        p[k] = jnp.asarray(params[k]).astype(param_dtype)
    for k in ("b0", "b1", "b2"):
        p[k] = jnp.asarray(params[k]).astype(jnp.float32)
    return p


def _batch_tiling(B, tile_b, min_steps=2):
    """Adaptive, 8-aligned batch tiling with minimal padding.

    Forces >= min_steps grid steps for non-tiny batches so v7x's two
    TensorCores both get a balanced tile over the "parallel" axis."""
    tile_b = max(8, min(tile_b, 4096))     # cap: keep well under v5e's 16 MiB
    n_steps = pl.cdiv(B, tile_b)           #      default scoped-VMEM limit.
    if B >= 16:
        n_steps = max(n_steps, min_steps)
    tb = _round_up(pl.cdiv(B, n_steps), 8)
    n_steps = pl.cdiv(B, tb)
    return tb, n_steps, tb * n_steps


# ----------------------------------------------------------------------------
# Forward wrapper: one Pallas call, no per-call weight work
# ----------------------------------------------------------------------------
def residual_mlp_forward(x, params, *, tile_b=1024):
    """x: (B, input_dim) float32. params: output of prepare_params()."""
    w0, b0 = params["w0"], params["b0"]
    w1, b1 = params["w1"], params["b1"]
    w2, b2 = params["w2"], params["b2"]

    B, in_dim = x.shape
    hidden = w0.shape[1]
    out_dim = w2.shape[1]

    tb, n_steps, B_pad = _batch_tiling(B, tile_b)
    if B_pad != B:
        x = jnp.pad(x, ((0, B_pad - B), (0, 0)))   # few rows, exact (zeros)

    # Constant-index weight/bias specs: fetched once, resident across the grid.
    const = lambda shape: pl.BlockSpec(shape, lambda i: (0, 0))

    param_bytes = sum(int(v.size) * v.dtype.itemsize
                      for v in (w0, b0, w1, b1, w2, b2))
    cost = pl.CostEstimate(
        flops=2 * B_pad * (in_dim * hidden + hidden * hidden + hidden * out_dim),
        transcendentals=0,
        bytes_accessed=4 * B_pad * (in_dim + out_dim) + param_bytes,
    )

    out = pl.pallas_call(
        resmlp_kernel,
        out_shape=jax.ShapeDtypeStruct((B_pad, out_dim), x.dtype),
        grid_spec=pltpu.PrefetchScalarGridSpec(
            num_scalar_prefetch=0,
            grid=(n_steps,),
            in_specs=[
                pl.BlockSpec((tb, in_dim), lambda i: (i, 0)),   # x row tile
                const((in_dim, hidden)),                        # w0
                const((1, hidden)),                             # b0
                const((hidden, hidden)),                        # w1
                const((1, hidden)),                             # b1
                const((hidden, out_dim)),                       # w2
                const((1, out_dim)),                            # b2
            ],
            # Narrow output written directly: last block dim == full array dim.
            out_specs=pl.BlockSpec((tb, out_dim), lambda i: (i, 0)),
        ),
        compiler_params=pltpu.CompilerParams(
            dimension_semantics=("parallel",),
        ),
        cost_estimate=cost,
    )(x, w0, b0, w1, b1, w2, b2)

    return out[:B] if B_pad != B else out


# ----------------------------------------------------------------------------
# Synthetic params + pure-JAX reference
# ----------------------------------------------------------------------------
def make_params(key, input_dim, hidden, output_dim):
    """Deterministic synthetic parameters (uniform, PyTorch-Linear-like scale)."""
    ks = jax.random.split(key, 6)

    def lin(kw, kb, fan_in, fan_out):
        bound = 1.0 / jnp.sqrt(fan_in)
        w = jax.random.uniform(kw, (fan_in, fan_out), jnp.float32, -bound, bound)
        b = jax.random.uniform(kb, (1, fan_out), jnp.float32, -bound, bound)
        return w, b

    w0, b0 = lin(ks[0], ks[1], input_dim, hidden)
    w1, b1 = lin(ks[2], ks[3], hidden, hidden)
    w2, b2 = lin(ks[4], ks[5], hidden, output_dim)
    return {"w0": w0, "b0": b0, "w1": w1, "b1": b1, "w2": w2, "b2": b2}


def reference_forward(x, p):
    """Pure-JAX replica of the PyTorch forward for verification."""
    relu = lambda v: jnp.maximum(v, 0.0)
    h = relu(x @ p["w0"] + p["b0"])
    h = h + relu(relu(h))                    # ReLU module in the loop
    h = h + relu(h @ p["w1"] + p["b1"])      # Linear module in the loop
    h = h + relu(relu(h))                    # ReLU module in the loop
    return h @ p["w2"] + p["b2"]


if __name__ == "__main__":
    key = jax.random.PRNGKey(0)
    k_x, k_p = jax.random.split(key)

    # Ragged batch exercises the adaptive tiling: 300 rows -> 2 tiles of 152
    # (304 padded rows, <2% waste) and a 2-step "parallel" grid for v7x.
    batch, input_dim, hidden, output_dim = 300, 32, 128, 16
    x = jax.random.normal(k_x, (batch, input_dim), dtype=jnp.float32)
    raw_params = make_params(k_p, input_dim, hidden, output_dim)

    # One-time parameter prep, hoisted out of the per-call forward path.
    # (Use param_dtype=jnp.bfloat16 on v6e/v7x once tolerance is accepted.)
    params = prepare_params(raw_params, param_dtype=jnp.float32)

    out = residual_mlp_forward(x, params, tile_b=1024)
    out = jax.block_until_ready(out)

    ref = reference_forward(x, raw_params)
    assert out.shape == (batch, output_dim)
    assert jnp.allclose(out, ref, atol=1e-4, rtol=1e-4), "mismatch vs reference"

    print("KERNEL_OK")
</pallas_src>

<mosaic_0001>
module attributes {stable_mosaic.version = 11 : i64} {
  func.func @resmlp_kernel(%arg0: i32, %arg1: memref<152x32xf32, #tpu.memory_space<vmem>>, %arg2: memref<32x128xf32, #tpu.memory_space<vmem>>, %arg3: memref<1x128xf32, #tpu.memory_space<vmem>>, %arg4: memref<128x128xf32, #tpu.memory_space<vmem>>, %arg5: memref<1x128xf32, #tpu.memory_space<vmem>>, %arg6: memref<128x16xf32, #tpu.memory_space<vmem>>, %arg7: memref<1x16xf32, #tpu.memory_space<vmem>>, %arg8: memref<152x16xf32, #tpu.memory_space<vmem>>) attributes {dimension_semantics = [#tpu.dimension_semantics<parallel>], iteration_bounds = array<i64: 2>, scalar_prefetch = 0 : i64, scratch_operands = 0 : i64, tpu.core_type = #tpu.core_type<tc>, window_params = [{transform_indices = @transform_0, window_bounds = array<i64: 152, 32>}, {pipeline_mode = #tpu.pipeline_mode<synchronous>, transform_indices = @transform_1, window_bounds = array<i64: 32, 128>}, {pipeline_mode = #tpu.pipeline_mode<synchronous>, transform_indices = @transform_2, window_bounds = array<i64: 1, 128>}, {pipeline_mode = #tpu.pipeline_mode<synchronous>, transform_indices = @transform_3, window_bounds = array<i64: 128, 128>}, {pipeline_mode = #tpu.pipeline_mode<synchronous>, transform_indices = @transform_4, window_bounds = array<i64: 1, 128>}, {pipeline_mode = #tpu.pipeline_mode<synchronous>, transform_indices = @transform_5, window_bounds = array<i64: 128, 16>}, {pipeline_mode = #tpu.pipeline_mode<synchronous>, transform_indices = @transform_6, window_bounds = array<i64: 1, 16>}, {transform_indices = @transform_7, window_bounds = array<i64: 152, 16>}]} {
    %c0 = arith.constant 0 : index
    %c0_0 = arith.constant 0 : index
    %0 = vector.load %arg1[%c0, %c0_0] : memref<152x32xf32, #tpu.memory_space<vmem>>, vector<152x32xf32>
    %c0_1 = arith.constant 0 : index
    %c0_2 = arith.constant 0 : index
    %1 = vector.load %arg2[%c0_1, %c0_2] : memref<32x128xf32, #tpu.memory_space<vmem>>, vector<32x128xf32>
    %cst = arith.constant dense<0.000000e+00> : vector<152x128xf32>
    %2 = tpu.matmul %0, %1, %cst {dimension_numbers = #tpu.dot_dimension_numbers<[1], [0], [0], [1], [0, 0, 1, 1], [], []>} : vector<152x32xf32>, vector<32x128xf32>, vector<152x128xf32> -> vector<152x128xf32>
    %c0_3 = arith.constant 0 : index
    %c0_4 = arith.constant 0 : index
    %3 = vector.load %arg3[%c0_3, %c0_4] : memref<1x128xf32, #tpu.memory_space<vmem>>, vector<1x128xf32>
    %4 = vector.broadcast %3 : vector<1x128xf32> to vector<152x128xf32>
    %5 = arith.addf %2, %4 : vector<152x128xf32>
    %cst_5 = arith.constant 0.000000e+00 : f32
    %6 = vector.broadcast %cst_5 : f32 to vector<152x128xf32>
    %7 = arith.maximumf %5, %6 : vector<152x128xf32>
    %cst_6 = arith.constant 2.000000e+00 : f32
    %8 = vector.broadcast %cst_6 : f32 to vector<152x128xf32>
    %9 = arith.mulf %7, %8 : vector<152x128xf32>
    %c0_7 = arith.constant 0 : index
    %c0_8 = arith.constant 0 : index
    %10 = vector.load %arg4[%c0_7, %c0_8] : memref<128x128xf32, #tpu.memory_space<vmem>>, vector<128x128xf32>
    %cst_9 = arith.constant dense<0.000000e+00> : vector<152x128xf32>
    %11 = tpu.matmul %9, %10, %cst_9 {dimension_numbers = #tpu.dot_dimension_numbers<[1], [0], [0], [1], [0, 0, 1, 1], [], []>} : vector<152x128xf32>, vector<128x128xf32>, vector<152x128xf32> -> vector<152x128xf32>
    %c0_10 = arith.constant 0 : index
    %c0_11 = arith.constant 0 : index
    %12 = vector.load %arg5[%c0_10, %c0_11] : memref<1x128xf32, #tpu.memory_space<vmem>>, vector<1x128xf32>
    %13 = vector.broadcast %12 : vector<1x128xf32> to vector<152x128xf32>
    %14 = arith.addf %11, %13 : vector<152x128xf32>
    %cst_12 = arith.constant 0.000000e+00 : f32
    %15 = vector.broadcast %cst_12 : f32 to vector<152x128xf32>
    %16 = arith.maximumf %14, %15 : vector<152x128xf32>
    %17 = arith.addf %9, %16 : vector<152x128xf32>
    %cst_13 = arith.constant 2.000000e+00 : f32
    %18 = vector.broadcast %cst_13 : f32 to vector<152x128xf32>
    %19 = arith.mulf %17, %18 : vector<152x128xf32>
    %c0_14 = arith.constant 0 : index
    %c0_15 = arith.constant 0 : index
    %20 = vector.load %arg6[%c0_14, %c0_15] : memref<128x16xf32, #tpu.memory_space<vmem>>, vector<128x16xf32>
    %cst_16 = arith.constant dense<0.000000e+00> : vector<152x16xf32>
    %21 = tpu.matmul %19, %20, %cst_16 {dimension_numbers = #tpu.dot_dimension_numbers<[1], [0], [0], [1], [0, 0, 1, 1], [], []>} : vector<152x128xf32>, vector<128x16xf32>, vector<152x16xf32> -> vector<152x16xf32>
    %c0_17 = arith.constant 0 : index
    %c0_18 = arith.constant 0 : index
    %22 = vector.load %arg7[%c0_17, %c0_18] : memref<1x16xf32, #tpu.memory_space<vmem>>, vector<1x16xf32>
    %23 = vector.broadcast %22 : vector<1x16xf32> to vector<152x16xf32>
    %24 = arith.addf %21, %23 : vector<152x16xf32>
    %c0_19 = arith.constant 0 : index
    %c0_20 = arith.constant 0 : index
    %25 = vector.load %arg8[%c0_19, %c0_20] : memref<152x16xf32, #tpu.memory_space<vmem>>, vector<152x16xf32>
    tpu.vector_store %arg8[%c0_19, %c0_20], %24 {strides = array<i32>} : memref<152x16xf32, #tpu.memory_space<vmem>>, vector<152x16xf32>,
    return
  }
  func.func @transform_0(%arg0: i32) -> (i32, i32) {
    %c0_i32 = arith.constant 0 : i32
    %c0_i32_0 = arith.constant 0 : i32
    return %arg0, %c0_i32 : i32, i32
  }
  func.func @transform_1(%arg0: i32) -> (i32, i32) {
    %c0_i32 = arith.constant 0 : i32
    %c0_i32_0 = arith.constant 0 : i32
    %c0_i32_1 = arith.constant 0 : i32
    return %c0_i32, %c0_i32_0 : i32, i32
  }
  func.func @transform_2(%arg0: i32) -> (i32, i32) {
    %c0_i32 = arith.constant 0 : i32
    %c0_i32_0 = arith.constant 0 : i32
    %c0_i32_1 = arith.constant 0 : i32
    return %c0_i32, %c0_i32_0 : i32, i32
  }
  func.func @transform_3(%arg0: i32) -> (i32, i32) {
    %c0_i32 = arith.constant 0 : i32
    %c0_i32_0 = arith.constant 0 : i32
    %c0_i32_1 = arith.constant 0 : i32
    return %c0_i32, %c0_i32_0 : i32, i32
  }
  func.func @transform_4(%arg0: i32) -> (i32, i32) {
    %c0_i32 = arith.constant 0 : i32
    %c0_i32_0 = arith.constant 0 : i32
    %c0_i32_1 = arith.constant 0 : i32
    return %c0_i32, %c0_i32_0 : i32, i32
  }
  func.func @transform_5(%arg0: i32) -> (i32, i32) {
    %c0_i32 = arith.constant 0 : i32
    %c0_i32_0 = arith.constant 0 : i32
    %c0_i32_1 = arith.constant 0 : i32
    return %c0_i32, %c0_i32_0 : i32, i32
  }
  func.func @transform_6(%arg0: i32) -> (i32, i32) {
    %c0_i32 = arith.constant 0 : i32
    %c0_i32_0 = arith.constant 0 : i32
    %c0_i32_1 = arith.constant 0 : i32
    return %c0_i32, %c0_i32_0 : i32, i32
  }
  func.func @transform_7(%arg0: i32) -> (i32, i32) {
    %c0_i32 = arith.constant 0 : i32
    %c0_i32_0 = arith.constant 0 : i32
    return %arg0, %c0_i32 : i32, i32
  }
}

</mosaic_0001>

<bundles_post_ra>
// kernel: tpu_custom_call.1
= control target key start
LH: loop header
LB: loop body
LE: loop exit
PB: predicated region body
PF: predicated region fallthrough
CT: control target
= control target key end

     0   :  { %s919_s24 = smov 0   ;;  %s1279_s0 = inlined_call_operand.vmem [shape: f32[304,32], index: 0, kind: input, shape index: {}]   ;;  %s1280_s1 = inlined_call_operand.vmem [shape: f32[32,128], index: 1, kind: input, shape index: {}]   ;;  %s1281_s2 = inlined_call_operand.vmem [shape: f32[1,128], index: 2, kind: input, shape index: {}]   ;;  %s1282_s3 = inlined_call_operand.vmem [shape: f32[128,128], index: 3, kind: input, shape index: {}]   ;;  %s1283_s4 = inlined_call_operand.vmem [shape: f32[1,128], index: 4, kind: input, shape index: {}]   ;;  %s1284_s5 = inlined_call_operand.vmem [shape: f32[128,16], index: 5, kind: input, shape index: {}]   ;;  %s1285_s6 = inlined_call_operand.vmem [shape: f32[1,16], index: 6, kind: input, shape index: {}]   ;;  %s1286_s7 = inlined_call_operand.vmem [shape: f32[304,16], index: 7, kind: output, shape index: {}]  }
   0x1 LB: > { %s800_s25 = sadd.s32 4294967295, %s877_s24   ;;  %p804_p0 = scmp.ge.s32.totalorder %s877_s24, 1  ;;  %s877_s24 = sphi %s919_s24, %s17_s24  }
   0x2   : > { %p238_p1 = scmp.lt.s32.totalorder %s877_s24, 3 }
   0x4   : > { %p239_p2 = pnand %p804_p0, %p238_p1 }
   0x5   : > { %s270_s30 = smul.u32 (!%p239_p2), 19, %s800_s25 }
   0x6   : > { %242 = sbr.rel (%p239_p2) target bundleno = 570 (0x23a), region = 48 }
   0x7   : > { %p271_p3 = scmp.lt.s32.totalorder (!%p239_p2), %s270_s30, 37 }
   0xb   : > { %v304_v0 = vld [vmem:[%s1280_s1 + $0x18] sm:$0xff]  ;;  %v303_v1 = vld [vmem:[%s1280_s1 + $0x10] sm:$0xff]  ;;  %v302_v2 = vld [vmem:[%s1280_s1 + $0x8] sm:$0xff]  ;;  %s1288_s30 = smov (!%p271_p3, %s270_s30), 37  ;;  %vm309_vm0 = vcmask 261120   ;;  %vm724_vm1 = vcmask 130048  }
   0xc   : > { %379 = vmatpush.msra.mxu0 %v304_v0  ;;  %v301_v3 = vld [vmem:[%s1280_s1] sm:$0xff]  ;;  %s805_s12 = sshll.u32 %s1288_s30, 3  ;;  %v494_v13 = vld [vmem:[%s1282_s3 + $0x78] sm:$0xff]  ;;  %v493_v14 = vld [vmem:[%s1282_s3 + $0x70] sm:$0xff] }
   0xd   : > { %s947_s15 = scalar_lea.vmem %s1279_s0, %s805_s12  ;;  %499 = vmatpush.msra.mxu1 %v494_v13  ;;  %828 = vmatpush.msra.mxu3 %v494_v13  ;;  %v492_v16 = vld [vmem:[%s1282_s3 + $0x68] sm:$0xff]  ;;  %v491_v17 = vld [vmem:[%s1282_s3 + $0x60] sm:$0xff]  ;;  %v490_v18 = vld [vmem:[%s1282_s3 + $0x58] sm:$0xff]  ;;  %s1213_s8 = scalar_lea.vmem %s1286_s7, %s805_s12 }
   0xe   : > { %380 = vmatpush.msra.mxu0 %v303_v1  ;;  %v282_v4 = vld [vmem:[%s947_s15] sm:$0xff]  ;;  %v283_v5 = vld [vmem:[%s947_s15 + $0x8] sm:$0xff]  ;;  %v284_v6 = vld [vmem:[%s947_s15 + $0x10] sm:$0xff] }
   0xf   : > { %v285_v7 = vld [vmem:[%s947_s15 + $0x18] sm:$0xff]  ;;  %v286_v8 = vld [vmem:[%s947_s15 + $0x20] sm:$0xff]  ;;  %v287_v9 = vld [vmem:[%s947_s15 + $0x28] sm:$0xff]  ;;  %500 = vmatpush.msra.mxu1 %v493_v14  ;;  %829 = vmatpush.msra.mxu3 %v493_v14 }
  0x10   : > { %381 = vmatpush.msra.mxu0 %v302_v2  ;;  %v288_v10 = vld [vmem:[%s947_s15 + $0x30] sm:$0xff]  ;;  %v289_v11 = vld [vmem:[%s947_s15 + $0x38] sm:$0xff]  ;;  %v290_v12 = vld [vmem:[%s947_s15 + $0x40] sm:$0xff] }
  0x11   : > { %v291_v15 = vld [vmem:[%s947_s15 + $0x48] sm:$0xff]  ;;  %501 = vmatpush.msra.mxu1 %v492_v16  ;;  %830 = vmatpush.msra.mxu3 %v492_v16  ;;  %v489_v19 = vld [vmem:[%s1282_s3 + $0x50] sm:$0xff]  ;;  %v487_v22 = vld [vmem:[%s1282_s3 + $0x40] sm:$0xff] }
  0x12   : > { %382 = vmatpush.msra.mxu0 %v301_v3  ;;  %v292_v20 = vld [vmem:[%s947_s15 + $0x50] sm:$0xff]  ;;  %v488_v21 = vld [vmem:[%s1282_s3 + $0x48] sm:$0xff]  ;;  %v486_v23 = vld [vmem:[%s1282_s3 + $0x38] sm:$0xff] }
  0x13   : > { %807 = vmatmul.msk.f32.vlgmr.msra.gmra.mxu0 %vm309_vm0, %v282_v4  ;;  %502 = vmatpush.msra.mxu1 %v491_v17  ;;  %v485_v24 = vld [vmem:[%s1282_s3 + $0x30] sm:$0xff]  ;;  %v293_v25 = vld [vmem:[%s947_s15 + $0x58] sm:$0xff]  ;;  %v484_v26 = vld [vmem:[%s1282_s3 + $0x28] sm:$0xff] }
  0x14   : > { %831 = vmatpush.msra.mxu3 %v491_v17  ;;  %v483_v27 = vld [vmem:[%s1282_s3 + $0x20] sm:$0xff]  ;;  %v482_v28 = vld [vmem:[%s1282_s3 + $0x18] sm:$0xff]  ;;  %v481_v30 = vld [vmem:[%s1282_s3 + $0x10] sm:$0xff] }
  0x15   : > { %503 = vmatpush.msra.mxu1 %v490_v18  ;;  %v294_v29 = vld [vmem:[%s947_s15 + $0x60] sm:$0xff]  ;;  %v480_v31 = vld [vmem:[%s1282_s3 + $0x8] sm:$0xff]  ;;  %v296_v34 = vld [vmem:[%s947_s15 + $0x70] sm:$0xff] }
  0x16   : > { %832 = vmatpush.msra.mxu3 %v490_v18  ;;  %v479_v32 = vld [vmem:[%s1282_s3] sm:$0xff]  ;;  %v295_v33 = vld [vmem:[%s947_s15 + $0x68] sm:$0xff]  ;;  %v297_v35 = vld [vmem:[%s947_s15 + $0x78] sm:$0xff] }
  0x17   : > { %504 = vmatpush.msra.mxu1 %v489_v19  ;;  %v1032_v36 = vld [vmem:[%s1281_s2] ss:$0 sm:$0xff]  ;;  %v299_v43 = vld [vmem:[%s947_s15 + $0x88] sm:$0xff]  ;;  %v300_v48 = vld [vmem:[%s947_s15 + $0x90] sm:$0xff] }
  0x18   : > { %833 = vmatpush.msra.mxu3 %v489_v19  ;;  %v298_v38 = vld [vmem:[%s947_s15 + $0x80] sm:$0xff]  ;;  %v644_v17 = vld [vmem:[%s1284_s5 + $0x70] sm:$0xff] }
  0x19   : > { %505 = vmatpush.msra.mxu1 %v488_v21 }
  0x1a   : > { %834 = vmatpush.msra.mxu3 %v488_v21 }
  0x1b   : > { %808 = vmatmul.msk.f32.gmra.mxu0 %vm309_vm0, %v283_v5  ;;  %506 = vmatpush.msra.mxu1 %v487_v22 }
  0x1c   : > { %835 = vmatpush.msra.mxu3 %v487_v22  ;;  %v642_v22 = vld [vmem:[%s1284_s5 + $0x60] sm:$0xff] }
  0x1d   : > { %507 = vmatpush.msra.mxu1 %v486_v23 }
  0x1e   : > { %836 = vmatpush.msra.mxu3 %v486_v23  ;;  %v641_v23 = vld [vmem:[%s1284_s5 + $0x58] sm:$0xff] }
  0x1f   : > { %508 = vmatpush.msra.mxu1 %v485_v24 }
  0x20   : > { %837 = vmatpush.msra.mxu3 %v485_v24 }
  0x21   : > { %509 = vmatpush.msra.mxu1 %v484_v26 }
  0x22   : > { %838 = vmatpush.msra.mxu3 %v484_v26 }
  0x23   : > { %809 = vmatmul.msk.f32.gmra.mxu0 %vm309_vm0, %v284_v6  ;;  %510 = vmatpush.msra.mxu1 %v483_v27 }
  0x24   : > { %839 = vmatpush.msra.mxu3 %v483_v27 }
  0x25   : > { %511 = vmatpush.msra.mxu1 %v482_v28 }
  0x26   : > { %840 = vmatpush.msra.mxu3 %v482_v28  ;;  %v639_v28 = vld [vmem:[%s1284_s5 + $0x48] sm:$0xff] }
  0x27   : > { %512 = vmatpush.msra.mxu1 %v481_v30 }
  0x28   : > { %841 = vmatpush.msra.mxu3 %v481_v30  ;;  %v638_v30 = vld [vmem:[%s1284_s5 + $0x40] sm:$0xff] }
  0x29   : > { %513 = vmatpush.msra.mxu1 %v480_v31 }
  0x2a   : > { %842 = vmatpush.msra.mxu3 %v480_v31  ;;  %v637_v31 = vld [vmem:[%s1284_s5 + $0x38] sm:$0xff] }
  0x2b   : > { %810 = vmatmul.msk.f32.gmra.mxu0 %vm309_vm0, %v285_v7  ;;  %514 = vmatpush.msra.mxu1 %v479_v32 }
  0x2c   : > { %843 = vmatpush.msra.mxu3 %v479_v32 }
  0x33   : > { %811 = vmatmul.msk.f32.gmra.mxu0 %vm309_vm0, %v286_v8 }
  0x3b   : > { %812 = vmatmul.msk.f32.gmra.mxu0 %vm309_vm0, %v287_v9 }
  0x43   : > { %813 = vmatmul.msk.f32.gmra.mxu0 %vm309_vm0, %v288_v10 }
  0x4b   : > { %814 = vmatmul.msk.f32.gmra.mxu0 %vm309_vm0, %v289_v11 }
  0x53   : > { %815 = vmatmul.msk.f32.gmra.mxu0 %vm309_vm0, %v290_v12 }
  0x5b   : > { %816 = vmatmul.msk.f32.gmra.mxu0 %vm309_vm0, %v291_v15  ;;  %v645_v15 = vld [vmem:[%s1284_s5 + $0x78] sm:$0xff] }
  0x5c   : > { %650 = vmatpush.msra.mxu2 %v645_v15  ;;  %844 = vmatpush.msrb.mxu3 %v645_v15 }
  0x5e   : > { %651 = vmatpush.msra.mxu2 %v644_v17  ;;  %845 = vmatpush.msrb.mxu3 %v644_v17 }
  0x63   : > { %817 = vmatmul.msk.f32.gmra.mxu0 %vm309_vm0, %v292_v20  ;;  %v643_v20 = vld [vmem:[%s1284_s5 + $0x68] sm:$0xff] }
  0x64   : > { %652 = vmatpush.msra.mxu2 %v643_v20  ;;  %846 = vmatpush.msrb.mxu3 %v643_v20 }
  0x66   : > { %653 = vmatpush.msra.mxu2 %v642_v22  ;;  %847 = vmatpush.msrb.mxu3 %v642_v22 }
  0x68   : > { %654 = vmatpush.msra.mxu2 %v641_v23  ;;  %848 = vmatpush.msrb.mxu3 %v641_v23 }
  0x6b   : > { %818 = vmatmul.msk.f32.gmra.mxu0 %vm309_vm0, %v293_v25  ;;  %v640_v25 = vld [vmem:[%s1284_s5 + $0x50] sm:$0xff] }
  0x6c   : > { %655 = vmatpush.msra.mxu2 %v640_v25  ;;  %849 = vmatpush.msrb.mxu3 %v640_v25 }
  0x6e   : > { %656 = vmatpush.msra.mxu2 %v639_v28  ;;  %850 = vmatpush.msrb.mxu3 %v639_v28 }
  0x70   : > { %657 = vmatpush.msra.mxu2 %v638_v30  ;;  %851 = vmatpush.msrb.mxu3 %v638_v30 }
  0x72   : > { %658 = vmatpush.msra.mxu2 %v637_v31  ;;  %852 = vmatpush.msrb.mxu3 %v637_v31 }
  0x73   : > { %819 = vmatmul.msk.f32.gmra.mxu0 %vm309_vm0, %v294_v29 }
  0x7b   : > { %820 = vmatmul.msk.f32.gmra.mxu0 %vm309_vm0, %v295_v33  ;;  %v636_v33 = vld [vmem:[%s1284_s5 + $0x30] sm:$0xff] }
  0x7c   : > { %659 = vmatpush.msra.mxu2 %v636_v33  ;;  %853 = vmatpush.msrb.mxu3 %v636_v33 }
  0x83   : > { %821 = vmatmul.msk.f32.gmra.mxu0 %vm309_vm0, %v296_v34 }
  0x8b   : > { %822 = vmatmul.msk.f32.gmra.mxu0 %vm309_vm0, %v297_v35 }
  0x90   : > { %v384_v37 = vpop.f32.mrf.mxu0 }
  0x91   : > { %v385_v39 = vadd.f32 %v1032_v36, %v384_v37  ;;  %v635_v37 = vld [vmem:[%s1284_s5 + $0x28] sm:$0xff] }
  0x92   : > { %660 = vmatpush.msra.mxu2 %v635_v37  ;;  %854 = vmatpush.msrb.mxu3 %v635_v37 }
  0x93   : > { %v441_v40 = vmax.f32 %v385_v39, 0.0  ;;  %823 = vmatmul.msk.f32.gmra.mxu0 %vm309_vm0, %v298_v38  ;;  %v634_v39 = vld [vmem:[%s1284_s5 + $0x20] sm:$0xff] }
  0x94   : > { %661 = vmatpush.msra.mxu2 %v634_v39  ;;  %855 = vmatpush.msrb.mxu3 %v634_v39 }
  0x95   : > { %v1037_v41 = vmul.f32 2.0, %v441_v40 }
  0x97   : > { %515 = vmatmul.f32.vlgmr.msra.gmra.mxu1 %v1037_v41 }
  0x98   : > { %v387_v42 = vpop.f32.mrf.mxu0 }
  0x99   : > { %v388_v44 = vadd.f32 %v1032_v36, %v387_v42  ;;  %v633_v42 = vld [vmem:[%s1284_s5 + $0x18] sm:$0xff] }
  0x9a   : > { %662 = vmatpush.msra.mxu2 %v633_v42  ;;  %856 = vmatpush.msrb.mxu3 %v633_v42 }
  0x9b   : > { %v442_v45 = vmax.f32 %v388_v44, 0.0  ;;  %824 = vmatmul.msk.f32.gmra.mxu0 %vm309_vm0, %v299_v43  ;;  %v632_v43 = vld [vmem:[%s1284_s5 + $0x10] sm:$0xff] }
  0x9c   : > { %663 = vmatpush.msra.mxu2 %v632_v43  ;;  %857 = vmatpush.msrb.mxu3 %v632_v43 }
  0x9d   : > { %v1043_v46 = vmul.f32 2.0, %v442_v45 }
  0x9f   : > { %518 = vmatmul.f32.gmra.mxu1 %v1043_v46 }
  0xa0   : > { %v390_v47 = vpop.f32.mrf.mxu0 }
  0xa1   : > { %v391_v49 = vadd.f32 %v1032_v36, %v390_v47  ;;  %v631_v47 = vld [vmem:[%s1284_s5 + $0x8] sm:$0xff] }
  0xa2   : > { %664 = vmatpush.msra.mxu2 %v631_v47  ;;  %858 = vmatpush.msrb.mxu3 %v631_v47 }
  0xa3   : > { %v443_v50 = vmax.f32 %v391_v49, 0.0  ;;  %825 = vmatmul.msk.f32.gmra.mxu0 %vm309_vm0, %v300_v48  ;;  %v630_v49 = vld [vmem:[%s1284_s5] sm:$0xff] }
  0xa4   : > { %665 = vmatpush.msra.mxu2 %v630_v49  ;;  %859 = vmatpush.msrb.mxu3 %v630_v49 }
  0xa5   : > { %v1049_v51 = vmul.f32 2.0, %v443_v50 }
  0xa7   : > { %521 = vmatmul.f32.gmra.mxu1 %v1049_v51 }
  0xa8   : > { %v393_v52 = vpop.f32.mrf.mxu0 }
  0xa9   : > { %v394_v53 = vadd.f32 %v1032_v36, %v393_v52 }
  0xab   : > { %v444_v54 = vmax.f32 %v394_v53, 0.0 }
  0xad   : > { %v1053_v55 = vmul.f32 2.0, %v444_v54 }
  0xaf   : > { %524 = vmatmul.f32.gmra.mxu1 %v1053_v55 }
  0xb0   : > { %v396_v56 = vpop.f32.mrf.mxu0 }
  0xb1   : > { %v397_v57 = vadd.f32 %v1032_v36, %v396_v56 }
  0xb3   : > { %v445_v58 = vmax.f32 %v397_v57, 0.0 }
  0xb5   : > { %v1057_v59 = vmul.f32 2.0, %v445_v58 }
  0xb7   : > { %527 = vmatmul.f32.gmra.mxu1 %v1057_v59 }
  0xb8   : > { %v399_v60 = vpop.f32.mrf.mxu0 }
  0xb9   : > { %v400_v61 = vadd.f32 %v1032_v36, %v399_v60 }
  0xbb   : > { %v446_v62 = vmax.f32 %v400_v61, 0.0 }
  0xbd   : > { %v1061_v63 = vmul.f32 2.0, %v446_v62 }
  0xbf   : > { %530 = vmatmul.f32.gmra.mxu1 %v1061_v63 }
  0xc0   : > { %v402_v0 = vpop.f32.mrf.mxu0 }
  0xc1   : > { %v403_v1 = vadd.f32 %v1032_v36, %v402_v0 }
  0xc3   : > { %v447_v2 = vmax.f32 %v403_v1, 0.0  ;;  %v1156_v1 = vld [vmem:[%s1283_s4] ss:$0 sm:$0xff] }
  0xc5   : > { %v1065_v3 = vmul.f32 2.0, %v447_v2 }
  0xc7   : > { %533 = vmatmul.f32.gmra.mxu1 %v1065_v3 }
  0xc8   : > { %v405_v4 = vpop.f32.mrf.mxu0 }
  0xc9   : > { %v406_v5 = vadd.f32 %v1032_v36, %v405_v4 }
  0xcb   : > { %v448_v6 = vmax.f32 %v406_v5, 0.0 }
  0xcd   : > { %v1069_v7 = vmul.f32 2.0, %v448_v6 }
  0xcf   : > { %536 = vmatmul.f32.gmra.mxu1 %v1069_v7 }
  0xd0   : > { %v408_v8 = vpop.f32.mrf.mxu0 }
  0xd1   : > { %v409_v9 = vadd.f32 %v1032_v36, %v408_v8 }
  0xd3   : > { %v449_v10 = vmax.f32 %v409_v9, 0.0 }
  0xd5   : > { %v1073_v11 = vmul.f32 2.0, %v449_v10 }
  0xd7   : > { %539 = vmatmul.f32.gmra.mxu1 %v1073_v11 }
  0xd8   : > { %v411_v12 = vpop.f32.mrf.mxu0 }
  0xd9   : > { %v412_v13 = vadd.f32 %v1032_v36, %v411_v12 }
  0xdb   : > { %v450_v14 = vmax.f32 %v412_v13, 0.0 }
  0xdd   : > { %v1080_v16 = vmul.f32 2.0, %v450_v14 }
  0xdf   : > { %542 = vmatmul.f32.gmra.mxu1 %v1080_v16 }
  0xe0   : > { %v414_v18 = vpop.f32.mrf.mxu0 }
  0xe1   : > { %v415_v19 = vadd.f32 %v1032_v36, %v414_v18 }
  0xe3   : > { %v451_v21 = vmax.f32 %v415_v19, 0.0 }
  0xe5   : > { %v1096_v24 = vmul.f32 2.0, %v451_v21 }
  0xe7   : > { %545 = vmatmul.f32.gmra.mxu1 %v1096_v24 }
  0xe8   : > { %v417_v26 = vpop.f32.mrf.mxu0 }
  0xe9   : > { %v418_v27 = vadd.f32 %v1032_v36, %v417_v26 }
  0xeb   : > { %v452_v29 = vmax.f32 %v418_v27, 0.0 }
  0xed   : > { %v1112_v32 = vmul.f32 2.0, %v452_v29 }
  0xef   : > { %548 = vmatmul.f32.gmra.mxu1 %v1112_v32 }
  0xf0   : > { %v420_v34 = vpop.f32.mrf.mxu0 }
  0xf1   : > { %v421_v35 = vadd.f32 %v1032_v36, %v420_v34 }
  0xf3   : > { %v453_v38 = vmax.f32 %v421_v35, 0.0 }
  0xf5   : > { %v1125_v40 = vmul.f32 2.0, %v453_v38 }
  0xf7   : > { %551 = vmatmul.f32.gmra.mxu1 %v1125_v40 }
  0xf8   : > { %v423_v44 = vpop.f32.mrf.mxu0 }
  0xf9   : > { %v424_v45 = vadd.f32 %v1032_v36, %v423_v44 }
  0xfb   : > { %v454_v48 = vmax.f32 %v424_v45, 0.0 }
  0xfd   : > { %v1141_v50 = vmul.f32 2.0, %v454_v48 }
  0xff   : > { %554 = vmatmul.f32.gmra.mxu1 %v1141_v50 }
 0x100   : > { %v426_v52 = vpop.f32.mrf.mxu0 }
 0x101   : > { %v427_v53 = vadd.f32 %v1032_v36, %v426_v52 }
 0x103   : > { %v455_v54 = vmax.f32 %v427_v53, 0.0 }
 0x105   : > { %v1145_v56 = vmul.f32 2.0, %v455_v54 }
 0x107   : > { %557 = vmatmul.f32.vlgmr.msra.gmra.mxu3 %v1145_v56 }
 0x108   : > { %v429_v57 = vpop.f32.mrf.mxu0 }
 0x109   : > { %v430_v58 = vadd.f32 %v1032_v36, %v429_v57 }
 0x10b   : > { %v456_v60 = vmax.f32 %v430_v58, 0.0 }
 0x10d   : > { %v1149_v61 = vmul.f32 2.0, %v456_v60 }
 0x10f   : > { %560 = vmatmul.f32.gmra.mxu3 %v1149_v61 }
 0x110   : > { %v432_v62 = vpop.f32.mrf.mxu0 }
 0x111   : > { %v433_v0 = vadd.f32 %v1032_v36, %v432_v62 }
 0x113   : > { %v457_v2 = vmax.f32 %v433_v0, 0.0 }
 0x114   : > { %v516_v4 = vpop.f32.mrf.mxu1 }
 0x115   : > { %v517_v5 = vadd.f32 %v1156_v1, %v516_v4  ;;  %v1159_v6 = vmul.f32 2.0, %v457_v2 }
 0x117   : > { %v573_v8 = vmax.f32 %v517_v5, 0.0  ;;  %563 = vmatmul.f32.gmra.mxu3 %v1159_v6 }
 0x118   : > { %v435_v9 = vpop.f32.mrf.mxu0 }
 0x119   : > { %v436_v10 = vadd.f32 %v1032_v36, %v435_v9  ;;  %v592_v12 = vadd.f32 %v573_v8, %v1037_v41 }
 0x11b   : > { %v458_v13 = vmax.f32 %v436_v10, 0.0  ;;  %v611_v14 = vmul.f32 2.0, %v592_v12 }
 0x11c   : > { %v519_v15 = vpop.f32.mrf.mxu1 }
 0x11d   : > { %v520_v17 = vadd.f32 %v1156_v1, %v519_v15  ;;  %666 = vmatmul.f32.vlgmr.msra.gmra.mxu2 %v611_v14  ;;  %v1165_v18 = vmul.f32 2.0, %v458_v13 }
 0x11f   : > { %v574_v19 = vmax.f32 %v520_v17, 0.0  ;;  %566 = vmatmul.f32.gmra.mxu3 %v1165_v18 }
 0x120   : > { %v438_v20 = vpop.f32.mrf.mxu0 }
 0x121   : > { %v439_v21 = vadd.f32 %v1032_v36, %v438_v20  ;;  %v593_v22 = vadd.f32 %v574_v19, %v1043_v46 }
 0x123   : > { %v459_v23 = vmax.f32 %v439_v21, 0.0  ;;  %v612_v25 = vmul.f32 2.0, %v593_v22 }
 0x124   : > { %v522_v26 = vpop.f32.mrf.mxu1 }
 0x125   : > { %v523_v41 = vadd.f32 %v1156_v1, %v522_v26  ;;  %669 = vmatmul.f32.gmra.mxu2 %v612_v25  ;;  %v1171_v27 = vmul.f32 2.0, %v459_v23 }
 0x127   : > { %v575_v28 = vmax.f32 %v523_v41, 0.0  ;;  %569 = vmatmul.f32.gmra.mxu3 %v1171_v27 }
 0x129   : > { %v594_v29 = vadd.f32 %v575_v28, %v1049_v51 }
 0x12b   : > { %v613_v30 = vmul.f32 2.0, %v594_v29 }
 0x12c   : > { %v525_v31 = vpop.f32.mrf.mxu1 }
 0x12d   : > { %v526_v33 = vadd.f32 %v1156_v1, %v525_v31  ;;  %672 = vmatmul.f32.gmra.mxu2 %v613_v30 }
 0x12f   : > { %v576_v36 = vmax.f32 %v526_v33, 0.0 }
 0x131   : > { %v595_v46 = vadd.f32 %v576_v36, %v1053_v55 }
 0x133   : > { %v614_v34 = vmul.f32 2.0, %v595_v46 }
 0x134   : > { %v528_v35 = vpop.f32.mrf.mxu1 }
 0x135   : > { %v529_v37 = vadd.f32 %v1156_v1, %v528_v35  ;;  %675 = vmatmul.f32.gmra.mxu2 %v614_v34 }
 0x137   : > { %v577_v38 = vmax.f32 %v529_v37, 0.0 }
 0x139   : > { %v596_v39 = vadd.f32 %v577_v38, %v1057_v59 }
 0x13b   : > { %v615_v42 = vmul.f32 2.0, %v596_v39 }
 0x13c   : > { %v531_v43 = vpop.f32.mrf.mxu1 }
 0x13d   : > { %v532_v51 = vadd.f32 %v1156_v1, %v531_v43  ;;  %678 = vmatmul.f32.gmra.mxu2 %v615_v42  ;;  %v1205_v43 = vld [vmem:[%s1285_s6] ss:$0 sm:$0xff] }
 0x13f   : > { %v578_v44 = vmax.f32 %v532_v51, 0.0 }
 0x141   : > { %v597_v45 = vadd.f32 %v578_v44, %v1061_v63 }
 0x143   : > { %v616_v47 = vmul.f32 2.0, %v597_v45 }
 0x144   : > { %v534_v48 = vpop.f32.mrf.mxu1 }
 0x145   : > { %v535_v55 = vadd.f32 %v1156_v1, %v534_v48  ;;  %681 = vmatmul.f32.gmra.mxu2 %v616_v47 }
 0x147   : > { %v579_v49 = vmax.f32 %v535_v55, 0.0 }
 0x149   : > { %v598_v52 = vadd.f32 %v579_v49, %v1065_v3 }
 0x14b   : > { %v617_v53 = vmul.f32 2.0, %v598_v52 }
 0x14c   : > { %v537_v54 = vpop.f32.mrf.mxu1 }
 0x14d   : > { %v538_v59 = vadd.f32 %v1156_v1, %v537_v54  ;;  %684 = vmatmul.f32.gmra.mxu2 %v617_v53 }
 0x14f   : > { %v580_v57 = vmax.f32 %v538_v59, 0.0 }
 0x151   : > { %v599_v58 = vadd.f32 %v580_v57, %v1069_v7 }
 0x153   : > { %v618_v60 = vmul.f32 2.0, %v599_v58 }
 0x154   : > { %v540_v62 = vpop.f32.mrf.mxu1 }
 0x155   : > { %v541_v63 = vadd.f32 %v1156_v1, %v540_v62  ;;  %687 = vmatmul.f32.gmra.mxu2 %v618_v60 }
 0x157   : > { %v581_v0 = vmax.f32 %v541_v63, 0.0 }
 0x159   : > { %v600_v2 = vadd.f32 %v581_v0, %v1073_v11 }
 0x15b   : > { %v619_v4 = vmul.f32 2.0, %v600_v2 }
 0x15c   : > { %v543_v5 = vpop.f32.mrf.mxu1 }
 0x15d   : > { %v544_v3 = vadd.f32 %v1156_v1, %v543_v5  ;;  %690 = vmatmul.f32.gmra.mxu2 %v619_v4 }
 0x15f   : > { %v582_v8 = vmax.f32 %v544_v3, 0.0 }
 0x161   : > { %v601_v9 = vadd.f32 %v582_v8, %v1080_v16 }
 0x163   : > { %v620_v10 = vmul.f32 2.0, %v601_v9 }
 0x164   : > { %v546_v12 = vpop.f32.mrf.mxu1 }
 0x165   : > { %v547_v7 = vadd.f32 %v1156_v1, %v546_v12  ;;  %693 = vmatmul.f32.gmra.mxu2 %v620_v10 }
 0x167   : > { %v583_v13 = vmax.f32 %v547_v7, 0.0 }
 0x169   : > { %v602_v14 = vadd.f32 %v583_v13, %v1096_v24 }
 0x16b   : > { %v621_v15 = vmul.f32 2.0, %v602_v14 }
 0x16c   : > { %v549_v17 = vpop.f32.mrf.mxu1 }
 0x16d   : > { %v550_v11 = vadd.f32 %v1156_v1, %v549_v17  ;;  %696 = vmatmul.f32.gmra.mxu2 %v621_v15 }
 0x16f   : > { %v584_v19 = vmax.f32 %v550_v11, 0.0 }
 0x171   : > { %v603_v20 = vadd.f32 %v584_v19, %v1112_v32 }
 0x173   : > { %v622_v21 = vmul.f32 2.0, %v603_v20 }
 0x174   : > { %v552_v22 = vpop.f32.mrf.mxu1 }
 0x175   : > { %v553_v16 = vadd.f32 %v1156_v1, %v552_v22  ;;  %699 = vmatmul.f32.gmra.mxu2 %v622_v21 }
 0x177   : > { %v585_v23 = vmax.f32 %v553_v16, 0.0 }
 0x179   : > { %v604_v25 = vadd.f32 %v585_v23, %v1125_v40 }
 0x17b   : > { %v623_v26 = vmul.f32 2.0, %v604_v25 }
 0x17c   : > { %v555_v41 = vpop.f32.mrf.mxu1 }
 0x17d   : > { %v556_v24 = vadd.f32 %v1156_v1, %v555_v41  ;;  %702 = vmatmul.f32.gmra.mxu2 %v623_v26 }
 0x17f   : > { %v586_v28 = vmax.f32 %v556_v24, 0.0 }
 0x181   : > { %v605_v29 = vadd.f32 %v586_v28, %v1141_v50 }
 0x183   : > { %v624_v30 = vmul.f32 2.0, %v605_v29 }
 0x185   : > { %705 = vmatmul.f32.gmra.mxu2 %v624_v30 }
 0x18a   : > { %v558_v31 = vpop.f32.mrf.mxu3 }
 0x18b   : > { %v559_v32 = vadd.f32 %v1156_v1, %v558_v31 }
 0x18d   : > { %v587_v33 = vmax.f32 %v559_v32, 0.0 }
 0x18f   : > { %v606_v36 = vadd.f32 %v587_v33, %v1145_v56 }
 0x191   : > { %v625_v46 = vmul.f32 2.0, %v606_v36 }
 0x192   : > { %v561_v34 = vpop.f32.mrf.mxu3 }
 0x193   : > { %v562_v40 = vadd.f32 %v1156_v1, %v561_v34  ;;  %708 = vmatmul.f32.vlgmr.msrb.gmra.mxu3 %v625_v46 }
 0x195   : > { %v588_v35 = vmax.f32 %v562_v40, 0.0 }
 0x197   : > { %v607_v37 = vadd.f32 %v588_v35, %v1149_v61 }
 0x199   : > { %v626_v38 = vmul.f32 2.0, %v607_v37 }
 0x19a   : > { %v564_v39 = vpop.f32.mrf.mxu3 }
 0x19b   : > { %v565_v50 = vadd.f32 %v1156_v1, %v564_v39  ;;  %711 = vmatmul.f32.gmra.mxu3 %v626_v38 }
 0x19d   : > { %v589_v42 = vmax.f32 %v565_v50, 0.0 }
 0x19f   : > { %v608_v56 = vadd.f32 %v589_v42, %v1159_v6 }
 0x1a0   : > { %v667_v61 = vpop.f32.mrf.mxu2 }
 0x1a1   : > { %v668_v51 = vadd.f32 %v1205_v43, %v667_v61  ;;  %v627_v44 = vmul.f32 2.0, %v608_v56 }
 0x1a2   : > { %v567_v45 = vpop.f32.mrf.mxu3 }
 0x1a3   : > { %725 = vst.msk [vmem:[%s1213_s8] sm:$0xff] %vm724_vm1, %v668_v51  ;;  %v568_v47 = vadd.f32 %v1156_v1, %v567_v45  ;;  %714 = vmatmul.f32.gmra.mxu3 %v627_v44 }
 0x1a5   : > { %v590_v6 = vmax.f32 %v568_v47, 0.0 }
 0x1a7   : > { %v609_v48 = vadd.f32 %v590_v6, %v1165_v18 }
 0x1a8   : > { %v670_v55 = vpop.f32.mrf.mxu2 }
 0x1a9   : > { %v671_v49 = vadd.f32 %v1205_v43, %v670_v55  ;;  %v628_v52 = vmul.f32 2.0, %v609_v48 }
 0x1aa   : > { %v570_v53 = vpop.f32.mrf.mxu3 }
 0x1ab   : > { %726 = vst.msk [vmem:[%s1213_s8 + $0x8] sm:$0xff] %vm724_vm1, %v671_v49  ;;  %v571_v54 = vadd.f32 %v1156_v1, %v570_v53  ;;  %717 = vmatmul.f32.gmra.mxu3 %v628_v52 }
 0x1ad   : > { %v591_v59 = vmax.f32 %v571_v54, 0.0 }
 0x1af   : > { %v610_v57 = vadd.f32 %v591_v59, %v1171_v27 }
 0x1b0   : > { %v673_v58 = vpop.f32.mrf.mxu2 }
 0x1b1   : > { %v674_v18 = vadd.f32 %v1205_v43, %v673_v58  ;;  %v629_v60 = vmul.f32 2.0, %v610_v57 }
 0x1b3   : > { %727 = vst.msk [vmem:[%s1213_s8 + $0x10] sm:$0xff] %vm724_vm1, %v674_v18  ;;  %720 = vmatmul.f32.gmra.mxu3 %v629_v60 }
 0x1b8   : > { %v676_v62 = vpop.f32.mrf.mxu2 }
 0x1b9   : > { %v677_v63 = vadd.f32 %v1205_v43, %v676_v62 }
 0x1bb   : > { %728 = vst.msk [vmem:[%s1213_s8 + $0x18] sm:$0xff] %vm724_vm1, %v677_v63 }
 0x1c0   : > { %v679_v1 = vpop.f32.mrf.mxu2 }
 0x1c1   : > { %v680_v0 = vadd.f32 %v1205_v43, %v679_v1 }
 0x1c3   : > { %729 = vst.msk [vmem:[%s1213_s8 + $0x20] sm:$0xff] %vm724_vm1, %v680_v0 }
 0x1c8   : > { %v682_v27 = vpop.f32.mrf.mxu2 }
 0x1c9   : > { %v683_v2 = vadd.f32 %v1205_v43, %v682_v27 }
 0x1cb   : > { %730 = vst.msk [vmem:[%s1213_s8 + $0x28] sm:$0xff] %vm724_vm1, %v683_v2 }
 0x1d0   : > { %v685_v4 = vpop.f32.mrf.mxu2 }
 0x1d1   : > { %v686_v5 = vadd.f32 %v1205_v43, %v685_v4 }
 0x1d3   : > { %731 = vst.msk [vmem:[%s1213_s8 + $0x30] sm:$0xff] %vm724_vm1, %v686_v5 }
 0x1d8   : > { %v688_v3 = vpop.f32.mrf.mxu2 }
 0x1d9   : > { %v689_v8 = vadd.f32 %v1205_v43, %v688_v3 }
 0x1db   : > { %732 = vst.msk [vmem:[%s1213_s8 + $0x38] sm:$0xff] %vm724_vm1, %v689_v8 }
 0x1e0   : > { %v691_v9 = vpop.f32.mrf.mxu2 }
 0x1e1   : > { %v692_v10 = vadd.f32 %v1205_v43, %v691_v9 }
 0x1e3   : > { %733 = vst.msk [vmem:[%s1213_s8 + $0x40] sm:$0xff] %vm724_vm1, %v692_v10 }
 0x1e8   : > { %v694_v12 = vpop.f32.mrf.mxu2 }
 0x1e9   : > { %v695_v7 = vadd.f32 %v1205_v43, %v694_v12 }
 0x1eb   : > { %734 = vst.msk [vmem:[%s1213_s8 + $0x48] sm:$0xff] %vm724_vm1, %v695_v7 }
 0x1f0   : > { %v697_v13 = vpop.f32.mrf.mxu2 }
 0x1f1   : > { %v698_v14 = vadd.f32 %v1205_v43, %v697_v13 }
 0x1f3   : > { %735 = vst.msk [vmem:[%s1213_s8 + $0x50] sm:$0xff] %vm724_vm1, %v698_v14 }
 0x1f8   : > { %v700_v15 = vpop.f32.mrf.mxu2 }
 0x1f9   : > { %v701_v17 = vadd.f32 %v1205_v43, %v700_v15 }
 0x1fb   : > { %736 = vst.msk [vmem:[%s1213_s8 + $0x58] sm:$0xff] %vm724_vm1, %v701_v17 }
 0x200   : > { %v703_v11 = vpop.f32.mrf.mxu2 }
 0x201   : > { %v704_v19 = vadd.f32 %v1205_v43, %v703_v11 }
 0x203   : > { %737 = vst.msk [vmem:[%s1213_s8 + $0x60] sm:$0xff] %vm724_vm1, %v704_v19 }
 0x208   : > { %v706_v20 = vpop.f32.mrf.mxu2 }
 0x209   : > { %v707_v21 = vadd.f32 %v1205_v43, %v706_v20 }
 0x20b   : > { %738 = vst.msk [vmem:[%s1213_s8 + $0x68] sm:$0xff] %vm724_vm1, %v707_v21 }
 0x216   : > { %v709_v22 = vpop.f32.mrf.mxu3 }
 0x217   : > { %v710_v16 = vadd.f32 %v1205_v43, %v709_v22 }
 0x219   : > { %739 = vst.msk [vmem:[%s1213_s8 + $0x70] sm:$0xff] %vm724_vm1, %v710_v16 }
 0x21e   : > { %v712_v23 = vpop.f32.mrf.mxu3 }
 0x21f   : > { %v713_v25 = vadd.f32 %v1205_v43, %v712_v23 }
 0x221   : > { %740 = vst.msk [vmem:[%s1213_s8 + $0x78] sm:$0xff] %vm724_vm1, %v713_v25 }
 0x226   : > { %v715_v26 = vpop.f32.mrf.mxu3 }
 0x227   : > { %v716_v41 = vadd.f32 %v1205_v43, %v715_v26 }
 0x229   : > { %741 = vst.msk [vmem:[%s1213_s8 + $0x80] sm:$0xff] %vm724_vm1, %v716_v41 }
 0x22e   : > { %v718_v24 = vpop.f32.mrf.mxu3 }
 0x22f   : > { %v719_v28 = vadd.f32 %v1205_v43, %v718_v24 }
 0x231   : > { %742 = vst.msk [vmem:[%s1213_s8 + $0x88] sm:$0xff] %vm724_vm1, %v719_v28 }
 0x236   : > { %v721_v29 = vpop.f32.mrf.mxu3 }
 0x237   : > { %v722_v30 = vadd.f32 %v1205_v43, %v721_v29 }
 0x239   : > { %743 = vst.msk [vmem:[%s1213_s8 + $0x90] sm:$0xff] %vm724_vm1, %v722_v30 }
 0x23a PF: > { %s17_s24 = sadd.s32 1, %s877_s24  }
 0x23b   : > { %p14_p4 = scmp.ge.s32.totalorder %s17_s24, 4  }
 0x23d   :  { %16 = sbr.rel (!%p14_p4) target bundleno = 1 (0x1), region = 78 }

</bundles_post_ra>
